<compile_context>
chip_gen: v6e
topology: v6e:2x2x1
jax: 0.10.0
libtpu: 0.0.40
codegen_flags: <defaults>
</compile_context>

<pallas_src>
import numpy as np
import jax
import jax.numpy as jnp
from jax.experimental import pallas as pl
from jax.experimental.pallas import tpu as pltpu


# ----------------------------------------------------------------------------
# DAG definition (concrete instantiation of `data` / `topologicalOrder`)
# ----------------------------------------------------------------------------

DATA = [
    {'blockName': 'conv', 'parent': [],     'args': dict(cin=4, cout=8, k=3, pad=1)},  # 0
    {'blockName': 'relu', 'parent': [0],    'args': {}},                               # 1
    {'blockName': 'conv', 'parent': [],     'args': dict(cin=4, cout=8, k=1, pad=0)},  # 2
    {'blockName': 'add',  'parent': [1, 2], 'args': {}},                               # 3
    {'blockName': 'conv', 'parent': [3],    'args': dict(cin=8, cout=8, k=3, pad=1)},  # 4
    {'blockName': 'relu', 'parent': [4],    'args': {}},                               # 5
]
DATA_LENGTH = len(DATA)
TOPOLOGICAL_ORDER = [0, 1, 2, 3, 4, 5]
# TODO(synk): other callBlock block types (pool, bn, concat, ...) are not instantiated here.


def init_params(key):
    """Deterministic parameter init for every conv node (HWIO weights + bias)."""
    params = [None] * DATA_LENGTH
    for idx in TOPOLOGICAL_ORDER:
        node = DATA[idx]
        if node['blockName'] == 'conv':
            a = node['args']
            key, kw, kb = jax.random.split(key, 3)
            fan_in = a['cin'] * a['k'] * a['k']
            w = jax.random.normal(kw, (a['k'], a['k'], a['cin'], a['cout']),
                                  jnp.float32) * (1.0 / jnp.sqrt(fan_in))
            b = jax.random.normal(kb, (a['cout'],), jnp.float32) * 0.01
            params[idx] = (w, b)
    return params


# ----------------------------------------------------------------------------
# Fused Pallas kernel: the whole DAG in one launch, intermediates in vregs
# ----------------------------------------------------------------------------

def _shift_rows(x, d):
    """Rows shifted by d (row h of result = x[h+d]); out-of-range rows are zero.

    This realizes the conv's vertical zero-padding without a padded scratch buffer."""
    H = x.shape[0]
    if d == 0:
        return x
    z = jnp.zeros((abs(d), x.shape[1]), x.dtype)
    if d < 0:
        return jnp.concatenate([z, x[:H + d, :]], axis=0)
    return jnp.concatenate([x[d:, :], z], axis=0)


def _im2row_slab(x_hc):
    """x_hc: (H, C*W) one batch element, channel-major lanes.

    Returns (H, 3*C*W): vertical taps d = -1, 0, +1 concatenated along lanes, so a 3x3
    conv becomes ONE matmul against the block-Toeplitz weight (K = 3*C*W)."""
    return jnp.concatenate([_shift_rows(x_hc, d) for d in (-1, 0, 1)], axis=1)


def _fused_dag_kernel(x_ref, a03_ref, b03_ref, a4_ref, b4_ref, o_ref):
    # x_ref   : (N, Cin, H, W)  f32   NCHW input (no wrapper relayout)
    # a03_ref : (3*Cin*W, W*(C0+C2)) bf16  block-Toeplitz weights, conv0 | conv2 merged
    # b03_ref : (1, W*(C0+C2))       f32   per-(cout, w) bias tiles, conv0 | conv2
    # a4_ref  : (3*C0*W, W*C4)       bf16  block-Toeplitz weights, conv4
    # b4_ref  : (1, W*C4)            f32
    # o_ref   : (N, C4, H, W)        f32   NCHW output (no wrapper relayout)
    N, Cin, H, W = x_ref.shape
    C4 = o_ref.shape[1]
    K3 = a4_ref.shape[0] // 3          # = W * C0, lane width of node-3 activations

    # ---- in-kernel NCHW -> (H, Cin*W) channel-major relayout + im2row slab ---------
    slab0 = jnp.concatenate([
        _im2row_slab(jnp.concatenate([x_ref[n, c] for c in range(Cin)], axis=1))
        for n in range(N)], axis=0)                       # (N*H, 3*Cin*W) f32

    # ---- nodes 0 & 2 (both read x), fused: ONE bf16 MXU push, f32 accumulation -----
    acc03 = jnp.dot(slab0.astype(jnp.bfloat16), a03_ref[...],
                    preferred_element_type=jnp.float32) + b03_ref[...]
    y1 = jnp.maximum(acc03[:, :K3], 0.0)                  # node 1: relu(conv0(x))
    y3 = y1 + acc03[:, K3:]                               # node 3: add(node1, conv2(x))

    # ---- node 4 (3x3 conv on node 3): ONE bf16 MXU push; node 5: relu --------------
    slab4 = jnp.concatenate([_im2row_slab(y3[n * H:(n + 1) * H, :])
                             for n in range(N)], axis=0)  # (N*H, 3*C0*W) f32
    acc4 = jnp.dot(slab4.astype(jnp.bfloat16), a4_ref[...],
                   preferred_element_type=jnp.float32) + b4_ref[...]
    out = jnp.maximum(acc4, 0.0)                          # node 5, (N*H, C4*W) f32

    # ---- in-kernel (H, C4*W) -> NCHW scatter (no wrapper transpose launches) -------
    for n in range(N):
        for c in range(C4):
            o_ref[n, c] = out[n * H:(n + 1) * H, c * W:(c + 1) * W].astype(o_ref.dtype)


# ----------------------------------------------------------------------------
# Block-Toeplitz weight construction (done once, on host, in numpy)
# ----------------------------------------------------------------------------

def _place_conv(T, w_hwio, W, col_off, pad):
    """Scatter a stride-1 HWIO conv weight into the block-Toeplitz matrix T.

    T row index    : ky_slab*(Cin*W) + cin*W + j     (vertical tap, in-chan, in-col)
    T column index : col_off + cout*W + wo           (out-chan major, out-col)
    so that  im2row_slab(x) @ T  ==  conv(x) laid out as (H, Cout*W) channel-major.
    Horizontal zero-padding is folded into T by dropping out-of-range taps; vertical
    padding comes from the zero rows of _shift_rows, hence ky_slab = ky + (1 - pad)."""
    KH, KW, Cin, Cout = w_hwio.shape
    K0 = Cin * W
    ky_off = 1 - pad
    for ky in range(KH):
        row_base = (ky + ky_off) * K0
        assert 0 <= row_base < T.shape[0]
        for kx in range(KW):
            lo, hi = max(0, pad - kx), min(W, W + pad - kx)
            if lo >= hi:
                continue
            wo = np.arange(lo, hi)
            j = wo + kx - pad                     # horizontal input index (unpadded)
            for ci in range(Cin):
                for co in range(Cout):
                    T[row_base + ci * W + j,
                      col_off + co * W + wo] = w_hwio[ky, kx, ci, co]


def make_forward(params, height, width):
    """Build the fused forward pass for this DAG at a fixed spatial size."""
    w0, b0 = params[0]
    w2, b2 = params[2]
    w4, b4 = params[4]
    w0_np, w2_np, w4_np = np.asarray(w0), np.asarray(w2), np.asarray(w4)
    b0_np, b2_np, b4_np = np.asarray(b0), np.asarray(b2), np.asarray(b4)

    Cin = w0_np.shape[2]
    C0, C2, C4 = w0_np.shape[3], w2_np.shape[3], w4_np.shape[3]
    assert C0 == C2 == w4_np.shape[2], "add / conv4 channel mismatch in DAG"
    H, W = height, width

    # conv0 (3x3, pad 1) and conv2 (1x1, pad 0) merged along output columns (shared x).
    a03 = np.zeros((3 * W * Cin, W * (C0 + C2)), np.float32)
    _place_conv(a03, w0_np, W, 0, DATA[0]['args']['pad'])
    _place_conv(a03, w2_np, W, W * C0, DATA[2]['args']['pad'])
    b03 = np.concatenate([np.repeat(b0_np, W), np.repeat(b2_np, W)])[None, :]

    # conv4 (3x3, pad 1).
    a4 = np.zeros((3 * W * C0, W * C4), np.float32)
    _place_conv(a4, w4_np, W, 0, DATA[4]['args']['pad'])
    b4t = np.repeat(b4_np, W)[None, :]

    # Toeplitz weights in bf16 (halve HBM weight traffic, native MXU dtype); biases f32.
    a03_j = jnp.asarray(a03, jnp.bfloat16)
    a4_j = jnp.asarray(a4, jnp.bfloat16)
    b03_j = jnp.asarray(b03, jnp.float32)
    b4_j = jnp.asarray(b4t, jnp.float32)

    @jax.jit
    def forward(x_nchw):
        N = x_nchw.shape[0]
        # Single grid step: batch is stacked along the matmul M dimension in-kernel,
        # weights are DMA'd once, and there are no wrapper-side relayout launches.
        return pl.pallas_call(
            _fused_dag_kernel,
            out_shape=jax.ShapeDtypeStruct((N, C4, H, W), jnp.float32),
            grid=(1,),
            in_specs=[
                pl.BlockSpec((N, Cin, H, W), lambda i: (0, 0, 0, 0)),
                pl.BlockSpec(a03_j.shape, lambda i: (0, 0)),
                pl.BlockSpec(b03_j.shape, lambda i: (0, 0)),
                pl.BlockSpec(a4_j.shape, lambda i: (0, 0)),
                pl.BlockSpec(b4_j.shape, lambda i: (0, 0)),
            ],
            out_specs=pl.BlockSpec((N, C4, H, W), lambda i: (0, 0, 0, 0)),
            compiler_params=pltpu.CompilerParams(
                dimension_semantics=("arbitrary",)),
        )(x_nchw, a03_j, b03_j, a4_j, b4_j)

    return forward


# ----------------------------------------------------------------------------
# Pure-JAX reference: literal mirror of model.forward's generic DAG loop
# ----------------------------------------------------------------------------

def _conv_ref(x_nhwc, w, b, pad):
    out = jax.lax.conv_general_dilated(
        x_nhwc, w, window_strides=(1, 1),
        padding=((pad, pad), (pad, pad)),
        dimension_numbers=("NHWC", "HWIO", "NHWC"),
        precision=jax.lax.Precision.HIGHEST)
    return out + b


def reference_forward(params, x_nchw):
    x = jnp.transpose(x_nchw, (0, 2, 3, 1))
    xs = [None] * DATA_LENGTH
    for idx in TOPOLOGICAL_ORDER:
        node = DATA[idx]
        parents = node['parent']
        if node['blockName'] == 'conv':
            w, b = params[idx]
            inp = x if len(parents) == 0 else xs[parents[0]]
            xs[idx] = _conv_ref(inp, w, b, node['args']['pad'])
        elif node['blockName'] == 'relu':
            xs[idx] = jnp.maximum(xs[parents[0]], 0.0)
        elif node['blockName'] == 'add':
            acc = xs[parents[0]]
            for j in parents[1:]:
                acc = acc + xs[j]
            xs[idx] = acc
        else:
            raise ValueError(node['blockName'])
    out = xs[TOPOLOGICAL_ORDER[-1]]
    return jnp.transpose(out, (0, 3, 1, 2))


if __name__ == "__main__":
    key = jax.random.PRNGKey(0)
    kx, kp = jax.random.split(key)
    x = jax.random.normal(kx, (2, 4, 16, 16), jnp.float32)   # NCHW like PyTorch

    params = init_params(kp)
    forward = make_forward(params, height=16, width=16)

    out = jax.block_until_ready(forward(x))
    assert out.shape == (2, 8, 16, 16), out.shape
    assert out.dtype == jnp.float32

    ref = jax.block_until_ready(reference_forward(params, x))
    max_err = float(jnp.max(jnp.abs(out - ref)))
    # bf16 MXU operands with f32 accumulation -> expect O(1e-2) abs error vs f32 reference.
    assert max_err < 5e-2, f"fused kernel mismatch vs reference: max abs err {max_err}"

    print("KERNEL_OK")
</pallas_src>

<mosaic_0001>
module attributes {stable_mosaic.version = 11 : i64} {
  func.func @_fused_dag_kernel(%arg0: i32, %arg1: memref<2x4x16x16xf32, #tpu.memory_space<vmem>>, %arg2: memref<192x256xbf16, #tpu.memory_space<vmem>>, %arg3: memref<1x256xf32, #tpu.memory_space<vmem>>, %arg4: memref<384x128xbf16, #tpu.memory_space<vmem>>, %arg5: memref<1x128xf32, #tpu.memory_space<vmem>>, %arg6: memref<2x8x16x16xf32, #tpu.memory_space<vmem>>) attributes {dimension_semantics = [#tpu.dimension_semantics<arbitrary>], iteration_bounds = array<i64: 1>, scalar_prefetch = 0 : i64, scratch_operands = 0 : i64, tpu.core_type = #tpu.core_type<tc>, window_params = [{pipeline_mode = #tpu.pipeline_mode<synchronous>, transform_indices = @transform_0, window_bounds = array<i64: 2, 4, 16, 16>}, {pipeline_mode = #tpu.pipeline_mode<synchronous>, transform_indices = @transform_1, window_bounds = array<i64: 192, 256>}, {pipeline_mode = #tpu.pipeline_mode<synchronous>, transform_indices = @transform_2, window_bounds = array<i64: 1, 256>}, {pipeline_mode = #tpu.pipeline_mode<synchronous>, transform_indices = @transform_3, window_bounds = array<i64: 384, 128>}, {pipeline_mode = #tpu.pipeline_mode<synchronous>, transform_indices = @transform_4, window_bounds = array<i64: 1, 128>}, {pipeline_mode = #tpu.pipeline_mode<synchronous>, transform_indices = @transform_5, window_bounds = array<i64: 2, 8, 16, 16>}]} {
    %c0 = arith.constant 0 : index
    %c0_0 = arith.constant 0 : index
    %c0_1 = arith.constant 0 : index
    %c0_2 = arith.constant 0 : index
    %0 = vector.load %arg1[%c0, %c0_0, %c0_1, %c0_2] : memref<2x4x16x16xf32, #tpu.memory_space<vmem>>, vector<1x1x16x16xf32>
    %1 = vector.shape_cast %0 : vector<1x1x16x16xf32> to vector<16x16xf32>
    %c0_3 = arith.constant 0 : index
    %c1 = arith.constant 1 : index
    %c0_4 = arith.constant 0 : index
    %c0_5 = arith.constant 0 : index
    %2 = vector.load %arg1[%c0_3, %c1, %c0_4, %c0_5] : memref<2x4x16x16xf32, #tpu.memory_space<vmem>>, vector<1x1x16x16xf32>
    %3 = vector.shape_cast %2 : vector<1x1x16x16xf32> to vector<16x16xf32>
    %c0_6 = arith.constant 0 : index
    %c2 = arith.constant 2 : index
    %c0_7 = arith.constant 0 : index
    %c0_8 = arith.constant 0 : index
    %4 = vector.load %arg1[%c0_6, %c2, %c0_7, %c0_8] : memref<2x4x16x16xf32, #tpu.memory_space<vmem>>, vector<1x1x16x16xf32>
    %5 = vector.shape_cast %4 : vector<1x1x16x16xf32> to vector<16x16xf32>
    %c0_9 = arith.constant 0 : index
    %c3 = arith.constant 3 : index
    %c0_10 = arith.constant 0 : index
    %c0_11 = arith.constant 0 : index
    %6 = vector.load %arg1[%c0_9, %c3, %c0_10, %c0_11] : memref<2x4x16x16xf32, #tpu.memory_space<vmem>>, vector<1x1x16x16xf32>
    %7 = vector.shape_cast %6 : vector<1x1x16x16xf32> to vector<16x16xf32>
    %8 = tpu.concatenate %1, %3, %5, %7 in 1 : vector<16x16xf32>, vector<16x16xf32>, vector<16x16xf32>, vector<16x16xf32> -> vector<16x64xf32>
    %cst = arith.constant 0.000000e+00 : f32
    %9 = vector.broadcast %cst : f32 to vector<1x64xf32>
    %10 = vector.extract_strided_slice %8 {offsets = [0, 0], sizes = [15, 64], strides = [1, 1]} : vector<16x64xf32> to vector<15x64xf32>
    %11 = tpu.concatenate %9, %10 in 0 : vector<1x64xf32>, vector<15x64xf32> -> vector<16x64xf32>
    %cst_12 = arith.constant 0.000000e+00 : f32
    %12 = vector.broadcast %cst_12 : f32 to vector<1x64xf32>
    %13 = vector.extract_strided_slice %8 {offsets = [1, 0], sizes = [15, 64], strides = [1, 1]} : vector<16x64xf32> to vector<15x64xf32>
    %14 = tpu.concatenate %13, %12 in 0 : vector<15x64xf32>, vector<1x64xf32> -> vector<16x64xf32>
    %15 = tpu.concatenate %11, %8, %14 in 1 : vector<16x64xf32>, vector<16x64xf32>, vector<16x64xf32> -> vector<16x192xf32>
    %c1_13 = arith.constant 1 : index
    %c0_14 = arith.constant 0 : index
    %c0_15 = arith.constant 0 : index
    %c0_16 = arith.constant 0 : index
    %16 = vector.load %arg1[%c1_13, %c0_14, %c0_15, %c0_16] : memref<2x4x16x16xf32, #tpu.memory_space<vmem>>, vector<1x1x16x16xf32>
    %17 = vector.shape_cast %16 : vector<1x1x16x16xf32> to vector<16x16xf32>
    %c1_17 = arith.constant 1 : index
    %c1_18 = arith.constant 1 : index
    %c0_19 = arith.constant 0 : index
    %c0_20 = arith.constant 0 : index
    %18 = vector.load %arg1[%c1_17, %c1_18, %c0_19, %c0_20] : memref<2x4x16x16xf32, #tpu.memory_space<vmem>>, vector<1x1x16x16xf32>
    %19 = vector.shape_cast %18 : vector<1x1x16x16xf32> to vector<16x16xf32>
    %c1_21 = arith.constant 1 : index
    %c2_22 = arith.constant 2 : index
    %c0_23 = arith.constant 0 : index
    %c0_24 = arith.constant 0 : index
    %20 = vector.load %arg1[%c1_21, %c2_22, %c0_23, %c0_24] : memref<2x4x16x16xf32, #tpu.memory_space<vmem>>, vector<1x1x16x16xf32>
    %21 = vector.shape_cast %20 : vector<1x1x16x16xf32> to vector<16x16xf32>
    %c1_25 = arith.constant 1 : index
    %c3_26 = arith.constant 3 : index
    %c0_27 = arith.constant 0 : index
    %c0_28 = arith.constant 0 : index
    %22 = vector.load %arg1[%c1_25, %c3_26, %c0_27, %c0_28] : memref<2x4x16x16xf32, #tpu.memory_space<vmem>>, vector<1x1x16x16xf32>
    %23 = vector.shape_cast %22 : vector<1x1x16x16xf32> to vector<16x16xf32>
    %24 = tpu.concatenate %17, %19, %21, %23 in 1 : vector<16x16xf32>, vector<16x16xf32>, vector<16x16xf32>, vector<16x16xf32> -> vector<16x64xf32>
    %cst_29 = arith.constant 0.000000e+00 : f32
    %25 = vector.broadcast %cst_29 : f32 to vector<1x64xf32>
    %26 = vector.extract_strided_slice %24 {offsets = [0, 0], sizes = [15, 64], strides = [1, 1]} : vector<16x64xf32> to vector<15x64xf32>
    %27 = tpu.concatenate %25, %26 in 0 : vector<1x64xf32>, vector<15x64xf32> -> vector<16x64xf32>
    %cst_30 = arith.constant 0.000000e+00 : f32
    %28 = vector.broadcast %cst_30 : f32 to vector<1x64xf32>
    %29 = vector.extract_strided_slice %24 {offsets = [1, 0], sizes = [15, 64], strides = [1, 1]} : vector<16x64xf32> to vector<15x64xf32>
    %30 = tpu.concatenate %29, %28 in 0 : vector<15x64xf32>, vector<1x64xf32> -> vector<16x64xf32>
    %31 = tpu.concatenate %27, %24, %30 in 1 : vector<16x64xf32>, vector<16x64xf32>, vector<16x64xf32> -> vector<16x192xf32>
    %32 = tpu.concatenate %15, %31 in 0 : vector<16x192xf32>, vector<16x192xf32> -> vector<32x192xf32>
    %33 = arith.truncf %32 : vector<32x192xf32> to vector<32x192xbf16>
    %c0_31 = arith.constant 0 : index
    %c0_32 = arith.constant 0 : index
    %34 = vector.load %arg2[%c0_31, %c0_32] : memref<192x256xbf16, #tpu.memory_space<vmem>>, vector<192x256xbf16>
    %cst_33 = arith.constant dense<0.000000e+00> : vector<32x256xf32>
    %35 = tpu.matmul %33, %34, %cst_33 {dimension_numbers = #tpu.dot_dimension_numbers<[1], [0], [0], [1], [0, 0, 1, 1], [], []>} : vector<32x192xbf16>, vector<192x256xbf16>, vector<32x256xf32> -> vector<32x256xf32>
    %c0_34 = arith.constant 0 : index
    %c0_35 = arith.constant 0 : index
    %36 = vector.load %arg3[%c0_34, %c0_35] : memref<1x256xf32, #tpu.memory_space<vmem>>, vector<1x256xf32>
    %37 = vector.broadcast %36 : vector<1x256xf32> to vector<32x256xf32>
    %38 = arith.addf %35, %37 : vector<32x256xf32>
    %39 = vector.extract_strided_slice %38 {offsets = [0, 0], sizes = [32, 128], strides = [1, 1]} : vector<32x256xf32> to vector<32x128xf32>
    %cst_36 = arith.constant 0.000000e+00 : f32
    %40 = vector.broadcast %cst_36 : f32 to vector<32x128xf32>
    %41 = arith.maximumf %39, %40 : vector<32x128xf32>
    %42 = vector.extract_strided_slice %38 {offsets = [0, 128], sizes = [32, 128], strides = [1, 1]} : vector<32x256xf32> to vector<32x128xf32>
    %43 = arith.addf %41, %42 : vector<32x128xf32>
    %44 = vector.extract_strided_slice %43 {offsets = [0, 0], sizes = [16, 128], strides = [1, 1]} : vector<32x128xf32> to vector<16x128xf32>
    %cst_37 = arith.constant 0.000000e+00 : f32
    %45 = vector.broadcast %cst_37 : f32 to vector<1x128xf32>
    %46 = vector.extract_strided_slice %44 {offsets = [0, 0], sizes = [15, 128], strides = [1, 1]} : vector<16x128xf32> to vector<15x128xf32>
    %47 = tpu.concatenate %45, %46 in 0 : vector<1x128xf32>, vector<15x128xf32> -> vector<16x128xf32>
    %cst_38 = arith.constant 0.000000e+00 : f32
    %48 = vector.broadcast %cst_38 : f32 to vector<1x128xf32>
    %49 = vector.extract_strided_slice %44 {offsets = [1, 0], sizes = [15, 128], strides = [1, 1]} : vector<16x128xf32> to vector<15x128xf32>
    %50 = tpu.concatenate %49, %48 in 0 : vector<15x128xf32>, vector<1x128xf32> -> vector<16x128xf32>
    %51 = tpu.concatenate %47, %44, %50 in 1 : vector<16x128xf32>, vector<16x128xf32>, vector<16x128xf32> -> vector<16x384xf32>
    %52 = vector.extract_strided_slice %43 {offsets = [16, 0], sizes = [16, 128], strides = [1, 1]} : vector<32x128xf32> to vector<16x128xf32>
    %cst_39 = arith.constant 0.000000e+00 : f32
    %53 = vector.broadcast %cst_39 : f32 to vector<1x128xf32>
    %54 = vector.extract_strided_slice %52 {offsets = [0, 0], sizes = [15, 128], strides = [1, 1]} : vector<16x128xf32> to vector<15x128xf32>
    %55 = tpu.concatenate %53, %54 in 0 : vector<1x128xf32>, vector<15x128xf32> -> vector<16x128xf32>
    %cst_40 = arith.constant 0.000000e+00 : f32
    %56 = vector.broadcast %cst_40 : f32 to vector<1x128xf32>
    %57 = vector.extract_strided_slice %52 {offsets = [1, 0], sizes = [15, 128], strides = [1, 1]} : vector<16x128xf32> to vector<15x128xf32>
    %58 = tpu.concatenate %57, %56 in 0 : vector<15x128xf32>, vector<1x128xf32> -> vector<16x128xf32>
    %59 = tpu.concatenate %55, %52, %58 in 1 : vector<16x128xf32>, vector<16x128xf32>, vector<16x128xf32> -> vector<16x384xf32>
    %60 = tpu.concatenate %51, %59 in 0 : vector<16x384xf32>, vector<16x384xf32> -> vector<32x384xf32>
    %61 = arith.truncf %60 : vector<32x384xf32> to vector<32x384xbf16>
    %c0_41 = arith.constant 0 : index
    %c0_42 = arith.constant 0 : index
    %62 = vector.load %arg4[%c0_41, %c0_42] : memref<384x128xbf16, #tpu.memory_space<vmem>>, vector<384x128xbf16>
    %cst_43 = arith.constant dense<0.000000e+00> : vector<32x128xf32>
    %63 = tpu.matmul %61, %62, %cst_43 {dimension_numbers = #tpu.dot_dimension_numbers<[1], [0], [0], [1], [0, 0, 1, 1], [], []>} : vector<32x384xbf16>, vector<384x128xbf16>, vector<32x128xf32> -> vector<32x128xf32>
    %c0_44 = arith.constant 0 : index
    %c0_45 = arith.constant 0 : index
    %64 = vector.load %arg5[%c0_44, %c0_45] : memref<1x128xf32, #tpu.memory_space<vmem>>, vector<1x128xf32>
    %65 = vector.broadcast %64 : vector<1x128xf32> to vector<32x128xf32>
    %66 = arith.addf %63, %65 : vector<32x128xf32>
    %cst_46 = arith.constant 0.000000e+00 : f32
    %67 = vector.broadcast %cst_46 : f32 to vector<32x128xf32>
    %68 = arith.maximumf %66, %67 : vector<32x128xf32>
    %69 = vector.extract_strided_slice %68 {offsets = [0, 0], sizes = [16, 16], strides = [1, 1]} : vector<32x128xf32> to vector<16x16xf32>
    %c0_47 = arith.constant 0 : index
    %c0_48 = arith.constant 0 : index
    %c0_49 = arith.constant 0 : index
    %c0_50 = arith.constant 0 : index
    %70 = vector.load %arg6[%c0_47, %c0_48, %c0_49, %c0_50] : memref<2x8x16x16xf32, #tpu.memory_space<vmem>>, vector<1x1x16x16xf32>
    %71 = vector.shape_cast %70 : vector<1x1x16x16xf32> to vector<16x16xf32>
    %72 = vector.shape_cast %69 : vector<16x16xf32> to vector<1x1x16x16xf32>
    tpu.vector_store %arg6[%c0_47, %c0_48, %c0_49, %c0_50], %72 {strides = array<i32>} : memref<2x8x16x16xf32, #tpu.memory_space<vmem>>, vector<1x1x16x16xf32>,
    %73 = vector.extract_strided_slice %68 {offsets = [0, 16], sizes = [16, 16], strides = [1, 1]} : vector<32x128xf32> to vector<16x16xf32>
    %c0_51 = arith.constant 0 : index
    %c1_52 = arith.constant 1 : index
    %c0_53 = arith.constant 0 : index
    %c0_54 = arith.constant 0 : index
    %74 = vector.load %arg6[%c0_51, %c1_52, %c0_53, %c0_54] : memref<2x8x16x16xf32, #tpu.memory_space<vmem>>, vector<1x1x16x16xf32>
    %75 = vector.shape_cast %74 : vector<1x1x16x16xf32> to vector<16x16xf32>
    %76 = vector.shape_cast %73 : vector<16x16xf32> to vector<1x1x16x16xf32>
    tpu.vector_store %arg6[%c0_51, %c1_52, %c0_53, %c0_54], %76 {strides = array<i32>} : memref<2x8x16x16xf32, #tpu.memory_space<vmem>>, vector<1x1x16x16xf32>,
    %77 = vector.extract_strided_slice %68 {offsets = [0, 32], sizes = [16, 16], strides = [1, 1]} : vector<32x128xf32> to vector<16x16xf32>
    %c0_55 = arith.constant 0 : index
    %c2_56 = arith.constant 2 : index
    %c0_57 = arith.constant 0 : index
    %c0_58 = arith.constant 0 : index
    %78 = vector.load %arg6[%c0_55, %c2_56, %c0_57, %c0_58] : memref<2x8x16x16xf32, #tpu.memory_space<vmem>>, vector<1x1x16x16xf32>
    %79 = vector.shape_cast %78 : vector<1x1x16x16xf32> to vector<16x16xf32>
    %80 = vector.shape_cast %77 : vector<16x16xf32> to vector<1x1x16x16xf32>
    tpu.vector_store %arg6[%c0_55, %c2_56, %c0_57, %c0_58], %80 {strides = array<i32>} : memref<2x8x16x16xf32, #tpu.memory_space<vmem>>, vector<1x1x16x16xf32>,
    %81 = vector.extract_strided_slice %68 {offsets = [0, 48], sizes = [16, 16], strides = [1, 1]} : vector<32x128xf32> to vector<16x16xf32>
    %c0_59 = arith.constant 0 : index
    %c3_60 = arith.constant 3 : index
    %c0_61 = arith.constant 0 : index
    %c0_62 = arith.constant 0 : index
    %82 = vector.load %arg6[%c0_59, %c3_60, %c0_61, %c0_62] : memref<2x8x16x16xf32, #tpu.memory_space<vmem>>, vector<1x1x16x16xf32>
    %83 = vector.shape_cast %82 : vector<1x1x16x16xf32> to vector<16x16xf32>
    %84 = vector.shape_cast %81 : vector<16x16xf32> to vector<1x1x16x16xf32>
    tpu.vector_store %arg6[%c0_59, %c3_60, %c0_61, %c0_62], %84 {strides = array<i32>} : memref<2x8x16x16xf32, #tpu.memory_space<vmem>>, vector<1x1x16x16xf32>,
    %85 = vector.extract_strided_slice %68 {offsets = [0, 64], sizes = [16, 16], strides = [1, 1]} : vector<32x128xf32> to vector<16x16xf32>
    %c0_63 = arith.constant 0 : index
    %c4 = arith.constant 4 : index
    %c0_64 = arith.constant 0 : index
    %c0_65 = arith.constant 0 : index
    %86 = vector.load %arg6[%c0_63, %c4, %c0_64, %c0_65] : memref<2x8x16x16xf32, #tpu.memory_space<vmem>>, vector<1x1x16x16xf32>
    %87 = vector.shape_cast %86 : vector<1x1x16x16xf32> to vector<16x16xf32>
    %88 = vector.shape_cast %85 : vector<16x16xf32> to vector<1x1x16x16xf32>
    tpu.vector_store %arg6[%c0_63, %c4, %c0_64, %c0_65], %88 {strides = array<i32>} : memref<2x8x16x16xf32, #tpu.memory_space<vmem>>, vector<1x1x16x16xf32>,
    %89 = vector.extract_strided_slice %68 {offsets = [0, 80], sizes = [16, 16], strides = [1, 1]} : vector<32x128xf32> to vector<16x16xf32>
    %c0_66 = arith.constant 0 : index
    %c5 = arith.constant 5 : index
    %c0_67 = arith.constant 0 : index
    %c0_68 = arith.constant 0 : index
    %90 = vector.load %arg6[%c0_66, %c5, %c0_67, %c0_68] : memref<2x8x16x16xf32, #tpu.memory_space<vmem>>, vector<1x1x16x16xf32>
    %91 = vector.shape_cast %90 : vector<1x1x16x16xf32> to vector<16x16xf32>
    %92 = vector.shape_cast %89 : vector<16x16xf32> to vector<1x1x16x16xf32>
    tpu.vector_store %arg6[%c0_66, %c5, %c0_67, %c0_68], %92 {strides = array<i32>} : memref<2x8x16x16xf32, #tpu.memory_space<vmem>>, vector<1x1x16x16xf32>,
    %93 = vector.extract_strided_slice %68 {offsets = [0, 96], sizes = [16, 16], strides = [1, 1]} : vector<32x128xf32> to vector<16x16xf32>
    %c0_69 = arith.constant 0 : index
    %c6 = arith.constant 6 : index
    %c0_70 = arith.constant 0 : index
    %c0_71 = arith.constant 0 : index
    %94 = vector.load %arg6[%c0_69, %c6, %c0_70, %c0_71] : memref<2x8x16x16xf32, #tpu.memory_space<vmem>>, vector<1x1x16x16xf32>
    %95 = vector.shape_cast %94 : vector<1x1x16x16xf32> to vector<16x16xf32>
    %96 = vector.shape_cast %93 : vector<16x16xf32> to vector<1x1x16x16xf32>
    tpu.vector_store %arg6[%c0_69, %c6, %c0_70, %c0_71], %96 {strides = array<i32>} : memref<2x8x16x16xf32, #tpu.memory_space<vmem>>, vector<1x1x16x16xf32>,
    %97 = vector.extract_strided_slice %68 {offsets = [0, 112], sizes = [16, 16], strides = [1, 1]} : vector<32x128xf32> to vector<16x16xf32>
    %c0_72 = arith.constant 0 : index
    %c7 = arith.constant 7 : index
    %c0_73 = arith.constant 0 : index
    %c0_74 = arith.constant 0 : index
    %98 = vector.load %arg6[%c0_72, %c7, %c0_73, %c0_74] : memref<2x8x16x16xf32, #tpu.memory_space<vmem>>, vector<1x1x16x16xf32>
    %99 = vector.shape_cast %98 : vector<1x1x16x16xf32> to vector<16x16xf32>
    %100 = vector.shape_cast %97 : vector<16x16xf32> to vector<1x1x16x16xf32>
    tpu.vector_store %arg6[%c0_72, %c7, %c0_73, %c0_74], %100 {strides = array<i32>} : memref<2x8x16x16xf32, #tpu.memory_space<vmem>>, vector<1x1x16x16xf32>,
    %101 = vector.extract_strided_slice %68 {offsets = [16, 0], sizes = [16, 16], strides = [1, 1]} : vector<32x128xf32> to vector<16x16xf32>
    %c1_75 = arith.constant 1 : index
    %c0_76 = arith.constant 0 : index
    %c0_77 = arith.constant 0 : index
    %c0_78 = arith.constant 0 : index
    %102 = vector.load %arg6[%c1_75, %c0_76, %c0_77, %c0_78] : memref<2x8x16x16xf32, #tpu.memory_space<vmem>>, vector<1x1x16x16xf32>
    %103 = vector.shape_cast %102 : vector<1x1x16x16xf32> to vector<16x16xf32>
    %104 = vector.shape_cast %101 : vector<16x16xf32> to vector<1x1x16x16xf32>
    tpu.vector_store %arg6[%c1_75, %c0_76, %c0_77, %c0_78], %104 {strides = array<i32>} : memref<2x8x16x16xf32, #tpu.memory_space<vmem>>, vector<1x1x16x16xf32>,
    %105 = vector.extract_strided_slice %68 {offsets = [16, 16], sizes = [16, 16], strides = [1, 1]} : vector<32x128xf32> to vector<16x16xf32>
    %c1_79 = arith.constant 1 : index
    %c1_80 = arith.constant 1 : index
    %c0_81 = arith.constant 0 : index
    %c0_82 = arith.constant 0 : index
    %106 = vector.load %arg6[%c1_79, %c1_80, %c0_81, %c0_82] : memref<2x8x16x16xf32, #tpu.memory_space<vmem>>, vector<1x1x16x16xf32>
    %107 = vector.shape_cast %106 : vector<1x1x16x16xf32> to vector<16x16xf32>
    %108 = vector.shape_cast %105 : vector<16x16xf32> to vector<1x1x16x16xf32>
    tpu.vector_store %arg6[%c1_79, %c1_80, %c0_81, %c0_82], %108 {strides = array<i32>} : memref<2x8x16x16xf32, #tpu.memory_space<vmem>>, vector<1x1x16x16xf32>,
    %109 = vector.extract_strided_slice %68 {offsets = [16, 32], sizes = [16, 16], strides = [1, 1]} : vector<32x128xf32> to vector<16x16xf32>
    %c1_83 = arith.constant 1 : index
    %c2_84 = arith.constant 2 : index
    %c0_85 = arith.constant 0 : index
    %c0_86 = arith.constant 0 : index
    %110 = vector.load %arg6[%c1_83, %c2_84, %c0_85, %c0_86] : memref<2x8x16x16xf32, #tpu.memory_space<vmem>>, vector<1x1x16x16xf32>
    %111 = vector.shape_cast %110 : vector<1x1x16x16xf32> to vector<16x16xf32>
    %112 = vector.shape_cast %109 : vector<16x16xf32> to vector<1x1x16x16xf32>
    tpu.vector_store %arg6[%c1_83, %c2_84, %c0_85, %c0_86], %112 {strides = array<i32>} : memref<2x8x16x16xf32, #tpu.memory_space<vmem>>, vector<1x1x16x16xf32>,
    %113 = vector.extract_strided_slice %68 {offsets = [16, 48], sizes = [16, 16], strides = [1, 1]} : vector<32x128xf32> to vector<16x16xf32>
    %c1_87 = arith.constant 1 : index
    %c3_88 = arith.constant 3 : index
    %c0_89 = arith.constant 0 : index
    %c0_90 = arith.constant 0 : index
    %114 = vector.load %arg6[%c1_87, %c3_88, %c0_89, %c0_90] : memref<2x8x16x16xf32, #tpu.memory_space<vmem>>, vector<1x1x16x16xf32>
    %115 = vector.shape_cast %114 : vector<1x1x16x16xf32> to vector<16x16xf32>
    %116 = vector.shape_cast %113 : vector<16x16xf32> to vector<1x1x16x16xf32>
    tpu.vector_store %arg6[%c1_87, %c3_88, %c0_89, %c0_90], %116 {strides = array<i32>} : memref<2x8x16x16xf32, #tpu.memory_space<vmem>>, vector<1x1x16x16xf32>,
    %117 = vector.extract_strided_slice %68 {offsets = [16, 64], sizes = [16, 16], strides = [1, 1]} : vector<32x128xf32> to vector<16x16xf32>
    %c1_91 = arith.constant 1 : index
    %c4_92 = arith.constant 4 : index
    %c0_93 = arith.constant 0 : index
    %c0_94 = arith.constant 0 : index
    %118 = vector.load %arg6[%c1_91, %c4_92, %c0_93, %c0_94] : memref<2x8x16x16xf32, #tpu.memory_space<vmem>>, vector<1x1x16x16xf32>
    %119 = vector.shape_cast %118 : vector<1x1x16x16xf32> to vector<16x16xf32>
    %120 = vector.shape_cast %117 : vector<16x16xf32> to vector<1x1x16x16xf32>
    tpu.vector_store %arg6[%c1_91, %c4_92, %c0_93, %c0_94], %120 {strides = array<i32>} : memref<2x8x16x16xf32, #tpu.memory_space<vmem>>, vector<1x1x16x16xf32>,
    %121 = vector.extract_strided_slice %68 {offsets = [16, 80], sizes = [16, 16], strides = [1, 1]} : vector<32x128xf32> to vector<16x16xf32>
    %c1_95 = arith.constant 1 : index
    %c5_96 = arith.constant 5 : index
    %c0_97 = arith.constant 0 : index
    %c0_98 = arith.constant 0 : index
    %122 = vector.load %arg6[%c1_95, %c5_96, %c0_97, %c0_98] : memref<2x8x16x16xf32, #tpu.memory_space<vmem>>, vector<1x1x16x16xf32>
    %123 = vector.shape_cast %122 : vector<1x1x16x16xf32> to vector<16x16xf32>
    %124 = vector.shape_cast %121 : vector<16x16xf32> to vector<1x1x16x16xf32>
    tpu.vector_store %arg6[%c1_95, %c5_96, %c0_97, %c0_98], %124 {strides = array<i32>} : memref<2x8x16x16xf32, #tpu.memory_space<vmem>>, vector<1x1x16x16xf32>,
    %125 = vector.extract_strided_slice %68 {offsets = [16, 96], sizes = [16, 16], strides = [1, 1]} : vector<32x128xf32> to vector<16x16xf32>
    %c1_99 = arith.constant 1 : index
    %c6_100 = arith.constant 6 : index
    %c0_101 = arith.constant 0 : index
    %c0_102 = arith.constant 0 : index
    %126 = vector.load %arg6[%c1_99, %c6_100, %c0_101, %c0_102] : memref<2x8x16x16xf32, #tpu.memory_space<vmem>>, vector<1x1x16x16xf32>
    %127 = vector.shape_cast %126 : vector<1x1x16x16xf32> to vector<16x16xf32>
    %128 = vector.shape_cast %125 : vector<16x16xf32> to vector<1x1x16x16xf32>
    tpu.vector_store %arg6[%c1_99, %c6_100, %c0_101, %c0_102], %128 {strides = array<i32>} : memref<2x8x16x16xf32, #tpu.memory_space<vmem>>, vector<1x1x16x16xf32>,
    %129 = vector.extract_strided_slice %68 {offsets = [16, 112], sizes = [16, 16], strides = [1, 1]} : vector<32x128xf32> to vector<16x16xf32>
    %c1_103 = arith.constant 1 : index
    %c7_104 = arith.constant 7 : index
    %c0_105 = arith.constant 0 : index
    %c0_106 = arith.constant 0 : index
    %130 = vector.load %arg6[%c1_103, %c7_104, %c0_105, %c0_106] : memref<2x8x16x16xf32, #tpu.memory_space<vmem>>, vector<1x1x16x16xf32>
    %131 = vector.shape_cast %130 : vector<1x1x16x16xf32> to vector<16x16xf32>
    %132 = vector.shape_cast %129 : vector<16x16xf32> to vector<1x1x16x16xf32>
    tpu.vector_store %arg6[%c1_103, %c7_104, %c0_105, %c0_106], %132 {strides = array<i32>} : memref<2x8x16x16xf32, #tpu.memory_space<vmem>>, vector<1x1x16x16xf32>,
    return
  }
  func.func @transform_0(%arg0: i32) -> (i32, i32, i32, i32) {
    %c0_i32 = arith.constant 0 : i32
    %c0_i32_0 = arith.constant 0 : i32
    %c0_i32_1 = arith.constant 0 : i32
    %c0_i32_2 = arith.constant 0 : i32
    %c0_i32_3 = arith.constant 0 : i32
    return %c0_i32, %c0_i32_0, %c0_i32_1, %c0_i32_2 : i32, i32, i32, i32
  }
  func.func @transform_1(%arg0: i32) -> (i32, i32) {
    %c0_i32 = arith.constant 0 : i32
    %c0_i32_0 = arith.constant 0 : i32
    %c0_i32_1 = arith.constant 0 : i32
    return %c0_i32, %c0_i32_0 : i32, i32
  }
  func.func @transform_2(%arg0: i32) -> (i32, i32) {
    %c0_i32 = arith.constant 0 : i32
    %c0_i32_0 = arith.constant 0 : i32
    %c0_i32_1 = arith.constant 0 : i32
    return %c0_i32, %c0_i32_0 : i32, i32
  }
  func.func @transform_3(%arg0: i32) -> (i32, i32) {
    %c0_i32 = arith.constant 0 : i32
    %c0_i32_0 = arith.constant 0 : i32
    %c0_i32_1 = arith.constant 0 : i32
    return %c0_i32, %c0_i32_0 : i32, i32
  }
  func.func @transform_4(%arg0: i32) -> (i32, i32) {
    %c0_i32 = arith.constant 0 : i32
    %c0_i32_0 = arith.constant 0 : i32
    %c0_i32_1 = arith.constant 0 : i32
    return %c0_i32, %c0_i32_0 : i32, i32
  }
  func.func @transform_5(%arg0: i32) -> (i32, i32, i32, i32) {
    %c0_i32 = arith.constant 0 : i32
    %c0_i32_0 = arith.constant 0 : i32
    %c0_i32_1 = arith.constant 0 : i32
    %c0_i32_2 = arith.constant 0 : i32
    %c0_i32_3 = arith.constant 0 : i32
    return %c0_i32, %c0_i32_0, %c0_i32_1, %c0_i32_2 : i32, i32, i32, i32
  }
}

</mosaic_0001>

<bundles_post_ra>
// kernel: forward.1
= control target key start
LH: loop header
LB: loop body
LE: loop exit
PB: predicated region body
PF: predicated region fallthrough
CT: control target
= control target key end

     0   :  { %10 = vsyncpa [#allocation3], 0  ;;  %s1415_s0 = inlined_call_operand.hbm [shape: f32[2,4,16,16], index: 0, kind: input, shape index: {}]   ;;  %s1416_s1 = inlined_call_operand.hbm [shape: bf16[192,256], index: 1, kind: input, shape index: {}]   ;;  %s1417_s2 = inlined_call_operand.vmem [shape: f32[1,256], index: 2, kind: input, shape index: {}]   ;;  %s1418_s3 = inlined_call_operand.hbm [shape: bf16[384,128], index: 3, kind: input, shape index: {}]   ;;  %s1419_s4 = inlined_call_operand.vmem [shape: f32[1,128], index: 4, kind: input, shape index: {}]   ;;  %s1420_s5 = inlined_call_operand.hbm [shape: f32[2,8,16,16], index: 5, kind: output, shape index: {}]  }
   0x1   :  { %11 = vsyncpa [#allocation6], 0 }
   0x2   :  { %12 = vsyncpa [#allocation4], 0  ;;  %s1235_s18 = smov [#allocation5]   ;;  %s1236_s20 = smov [#allocation2]  }
   0x3   :  { %s30_s19 = sshll.u32 %s1235_s18, 4  ;;  %s18_s21 = sshll.u32 %s1236_s20, 4  ;;  %s31_s19 = int_to_ptr.vmem [resolvable:$true] %s30_s19  ;;  %s19_s21 = int_to_ptr.vmem [resolvable:$true] %s18_s21 }
   0x4   :  { %s1157_s22 = scalar_lea.vmem %s31_s19, 3072  ;;  %p1162_p1 = scmp.lt.s32.totalorder %s31_s19, %s31_s19 }
   0x5   :  { %p1158_p0 = scmp.ne.s32.totalorder %s31_s19, %s1157_s22  ;;  %p1163_p2 = scmp.lt.s32.totalorder %s1157_s22, %s1157_s22 }
   0x7   :  { %p1164_p3 = por %p1163_p2, %p1162_p1 }
   0x9   :  { %p1165_p4 = pnand %p1164_p3, %p1158_p0 }
   0xb   :  { %1168 = shalt.err (!%p1165_p4)
}
   0xc   :  { %s1237_s23 = smov 128   ;;  %s1238_s24 = smov 8  }
   0xd   :  { %36 = dma.hbm_to_vmem [thread:$0]  %s1416_s1, 3072, %s31_s19, [#allocation6], %s1237_s23, %s1237_s23, %s1238_s24  }
   0xe   :  { %s1177_s27 = scalar_lea.vmem %s19_s21, 2048  ;;  %p1182_p6 = scmp.lt.s32.totalorder %s19_s21, %s19_s21 }
   0xf   :  { %p1178_p5 = scmp.ne.s32.totalorder %s19_s21, %s1177_s27  ;;  %p1183_p7 = scmp.lt.s32.totalorder %s1177_s27, %s1177_s27 }
  0x11   :  { %p1184_p8 = por %p1183_p7, %p1182_p6 }
  0x13   :  { %p1185_p9 = pnand %p1184_p8, %p1178_p5 }
  0x15   :  { %1188 = shalt.err (!%p1185_p9)
}
  0x16   :  { %24 = dma.hbm_to_vmem [thread:$0]  %s1415_s0, 2048, %s19_s21, [#allocation3], %s1237_s23, %s1237_s23, %s1238_s24  }
  0x17   :  { %s1239_s30 = smov [#allocation7]  }
  0x18   :  { %s44_s6 = sshll.u32 %s1239_s30, 4  ;;  %s45_s6 = int_to_ptr.vmem [resolvable:$true] %s44_s6 }
  0x19   :  { %s1197_s7 = scalar_lea.vmem %s45_s6, 3072  ;;  %p1202_p11 = scmp.lt.s32.totalorder %s45_s6, %s45_s6 }
  0x1a   :  { %p1198_p10 = scmp.ne.s32.totalorder %s45_s6, %s1197_s7  ;;  %p1203_p12 = scmp.lt.s32.totalorder %s1197_s7, %s1197_s7 }
  0x1c   :  { %p1204_p13 = por %p1203_p12, %p1202_p11 }
  0x1e   :  { %p1205_p0 = pnand %p1204_p13, %p1198_p10 }
  0x20   :  { %1208 = shalt.err (!%p1205_p0)
}
  0x21   :  { %s1240_s1 = smov 64   ;;  %s1241_s8 = smov 4  }
  0x22   :  { %50 = dma.hbm_to_vmem [thread:$0]  %s1418_s3, 3072, %s45_s6, [#allocation6], %s1240_s1, %s1240_s1, %s1241_s8  }
  0x23   :  { %1229 = dma.done.wait [#allocation3], 2048  }
  0x24   :  { %1230 = vsyncadd [#allocation3], 4294965248 }
  0x25   :  { %1231 = dma.done.wait [#allocation6], 6144  }
  0x26   :  { %1232 = vsyncadd [#allocation6], 4294961152  ;;  %v66_v0 = vld [vmem:[#allocation2 + $0x10] sm:$0xff]  ;;  %v67_v1 = vld [vmem:[#allocation2 + $0x18] sm:$0xff]  ;;  %s1242_s0 = smov 16   ;;  %s1243_s11 = smov 48  }
  0x27   :  { %v72_v2 = vld [vmem:[#allocation2 + $0x30] sm:$0xff]  ;;  %v1049_v3 = vpack.i.bf16 %v67_v1, %v66_v0  ;;  %v73_v4 = vld [vmem:[#allocation2 + $0x38] sm:$0xff]  ;;  %v69_v5 = vld [vmem:[#allocation2 + $0x20] sm:$0xff]  ;;  %s1244_s3 = smov 32   ;;  %vm98_vm0 = vcmask 130048   ;;  %vm101_vm1 = vcmask 261120  }
  0x28   :  { %v70_v6 = vld [vmem:[#allocation2 + $0x28] sm:$0xff]  ;;  %v1059_v7 = vpack.i.bf16 %v73_v4, %v72_v2  ;;  %v136_v8 = vld [vmem:[#allocation2 + $0x50] sm:$0xff]  ;;  %v137_v9 = vld [vmem:[#allocation2 + $0x58] sm:$0xff]  ;;  %vm104_vm2 = vcmask 392192   ;;  %vm116_vm3 = vcmask 1046528   ;;  %vm109_vm4 = vcmask 1040384  }
  0x29   :  { %1050 = vrot.lane.b32.xlu0 %v1049_v3, %s1242_s0  ;;  %v1054_v10 = vpack.i.bf16 %v70_v6, %v69_v5  ;;  %v1064_v11 = vpack.i.bf16 %v137_v9, %v136_v8  ;;  %v139_v12 = vld [vmem:[#allocation2 + $0x60] sm:$0xff]  ;;  %v140_v13 = vld [vmem:[#allocation2 + $0x68] sm:$0xff]  ;;  %v142_v14 = vld [vmem:[#allocation2 + $0x70] sm:$0xff]  ;;  %vm129_vm5 = vcmask 523264   ;;  %vm1245_vm7 = vmmov 1   ;;  %s1246_s15 = smov 112  }
  0x2a   :  { %1060 = vrot.lane.b32.xlu1 %v1059_v7, %s1243_s11  ;;  %v143_v15 = vld [vmem:[#allocation2 + $0x78] sm:$0xff]  ;;  %v1069_v18 = vpack.i.bf16 %v140_v13, %v139_v12  ;;  %v1092_v19 = vld [vmem:[#allocation5 + $0x64] ss:$8 sps:$4 sm:$0xff]   ;;  %v1094_v21 = vld [vmem:[#allocation5 + $0x60] ss:$8 sps:$4 sm:$0xff]   ;;  %s1248_s16 = smov 80  }
  0x2b   :  { %v1089_v16 = vld [vmem:[#allocation5 + $0x74] ss:$8 sps:$4 sm:$0xff]   ;;  %v1091_v17 = vld [vmem:[#allocation5 + $0x70] ss:$8 sps:$4 sm:$0xff]   ;;  %v1074_v20 = vpack.i.bf16 %v143_v15, %v142_v14  ;;  %v1098_v24 = vld [vmem:[#allocation5 + $0x44] ss:$8 sps:$4 sm:$0xff]  }
  0x2c   :  { %362 = vmatprep.subr.bf16.mxu0 %v1089_v16  ;;  %v1095_v22 = vld [vmem:[#allocation5 + $0x54] ss:$8 sps:$4 sm:$0xff]   ;;  %v1097_v23 = vld [vmem:[#allocation5 + $0x50] ss:$8 sps:$4 sm:$0xff]   ;;  %v1100_v25 = vld [vmem:[#allocation5 + $0x40] ss:$8 sps:$4 sm:$0xff]  }
  0x2d   :  { %1055 = vrot.lane.b32.xlu0 %v1054_v10, %s1244_s3  ;;  %363 = vmatpush1.bf16.msra.mxu0 %v1091_v17  ;;  %v1101_v26 = vld [vmem:[#allocation5 + $0x34] ss:$8 sps:$4 sm:$0xff]   ;;  %v1103_v27 = vld [vmem:[#allocation5 + $0x30] ss:$8 sps:$4 sm:$0xff]   ;;  %v1104_v28 = vld [vmem:[#allocation5 + $0x24] ss:$8 sps:$4 sm:$0xff]  }
  0x2e   :  { %1065 = vrot.lane.b32.xlu1 %v1064_v11, %s1242_s0  ;;  %364 = vmatprep.subr.bf16.mxu0 %v1092_v19  ;;  %v1106_v29 = vld [vmem:[#allocation5 + $0x20] ss:$8 sps:$4 sm:$0xff]   ;;  %v1107_v30 = vld [vmem:[#allocation5 + $0x14] ss:$8 sps:$4 sm:$0xff]   ;;  %v1109_v31 = vld [vmem:[#allocation5 + $0x10] ss:$8 sps:$4 sm:$0xff]  }
  0x2f   :  { %v1110_v32 = vld [vmem:[#allocation5 + $0x4] ss:$8 sps:$4 sm:$0xff]   ;;  %v1112_v33 = vld [vmem:[#allocation5] ss:$8 sps:$4 sm:$0xff]   ;;  %v1113_v34 = vld [vmem:[#allocation5 + $0xb4] ss:$8 sps:$4 sm:$0xff]  }
  0x30   :  { %v1115_v35 = vld [vmem:[#allocation5 + $0xb0] ss:$8 sps:$4 sm:$0xff]   ;;  %v1116_v36 = vld [vmem:[#allocation5 + $0xa4] ss:$8 sps:$4 sm:$0xff]   ;;  %v1118_v37 = vld [vmem:[#allocation5 + $0xa0] ss:$8 sps:$4 sm:$0xff]  }
  0x31   :  { %1070 = vrot.lane.b32.xlu0 %v1069_v18, %s1244_s3  ;;  %365 = vmatpush1.bf16.msra.mxu0 %v1094_v21  ;;  %v1119_v38 = vld [vmem:[#allocation5 + $0x94] ss:$8 sps:$4 sm:$0xff]   ;;  %v1121_v39 = vld [vmem:[#allocation5 + $0x90] ss:$8 sps:$4 sm:$0xff]   ;;  %v1122_v40 = vld [vmem:[#allocation5 + $0x84] ss:$8 sps:$4 sm:$0xff]  }
  0x32   :  { %1075 = vrot.lane.b32.xlu1 %v1074_v20, %s1243_s11  ;;  %366 = vmatprep.subr.bf16.mxu0 %v1095_v22  ;;  %v1124_v41 = vld [vmem:[#allocation5 + $0x80] ss:$8 sps:$4 sm:$0xff]   ;;  %v1125_v15 = vld [vmem:[#allocation7 + $0x78] sm:$0xff]   ;;  %v1127_v17 = vld [vmem:[#allocation7 + $0x70] sm:$0xff]   ;;  %s1249_s17 = smov [#allocation8]  }
  0x33   :  { %v63_v46 = vld [vmem:[#allocation2] sm:$0xff]  ;;  %v64_v47 = vld [vmem:[#allocation2 + $0x8] sm:$0xff]  ;;  %v1126_v16 = vld [vmem:[#allocation7 + $0x38] sm:$0xff]   ;;  %976 = vmatprep.subr.bf16.mxu1 %v1125_v15  ;;  %s898_s18 = sshll.u32 %s1249_s17, 4  ;;  %s899_s18 = int_to_ptr.vmem [resolvable:$true] %s898_s18 }
  0x34   :  { %v133_v53 = vld [vmem:[#allocation2 + $0x40] sm:$0xff]  ;;  %v134_v54 = vld [vmem:[#allocation2 + $0x48] sm:$0xff]  ;;  %977 = vmatpush3.bf16.msra.mxu1 %v1126_v16  ;;  %vm962_vm6 = vmneg %vm109_vm4  ;;  %s1209_s19 = scalar_lea.vmem %s899_s18, 4096  ;;  %p1214_p2 = scmp.lt.s32.totalorder %s899_s18, %s899_s18 }
  0x35   :  { %367 = vmatpush1.bf16.msra.mxu0 %v1097_v23  ;;  %978 = vmatprep.subr.bf16.mxu1 %v1127_v17  ;;  %vm1337_vm8 = vmpackc.low %vm1245_vm7, %vm962_vm6  ;;  %p1210_p1 = scmp.ne.s32.totalorder %s899_s18, %s1209_s19  ;;  %p1215_p3 = scmp.lt.s32.totalorder %s1209_s19, %s1209_s19 }
  0x36   :  { %368 = vmatprep.subr.bf16.mxu0 %v1098_v24  ;;  %vm1347_vm9 = vmpackc.low %vm116_vm3, %vm1245_vm7 }
  0x37   :  { %p1216_p4 = por %p1215_p3, %p1214_p2 }
  0x39   :  { %369 = vmatpush1.bf16.msra.mxu0 %v1100_v25  ;;  %p1217_p5 = pnand %p1216_p4, %p1210_p1 }
  0x3a   :  { %370 = vmatprep.subr.bf16.mxu0 %v1101_v26 }
  0x3d   :  { %371 = vmatpush1.bf16.msra.mxu0 %v1103_v27 }
  0x3e   :  { %372 = vmatprep.subr.bf16.mxu0 %v1104_v28 }
  0x41   :  { %373 = vmatpush1.bf16.msra.mxu0 %v1106_v29  ;;  %v1128_v29 = vld [vmem:[#allocation7 + $0x30] sm:$0xff]  }
  0x42   :  { %374 = vmatprep.subr.bf16.mxu0 %v1107_v30  ;;  %979 = vmatpush3.bf16.msra.mxu1 %v1128_v29 }
  0x45   :  { %375 = vmatpush1.bf16.msra.mxu0 %v1109_v31  ;;  %v1129_v31 = vld [vmem:[#allocation7 + $0x68] sm:$0xff]  }
  0x46   :  { %376 = vmatprep.subr.bf16.mxu0 %v1110_v32  ;;  %980 = vmatprep.subr.bf16.mxu1 %v1129_v31 }
  0x49   :  { %377 = vmatpush1.bf16.msra.mxu0 %v1112_v33 }
  0x4a   :  { %386 = vmatprep.subr.bf16.mxu0 %v1113_v34 }
  0x4d   :  { %387 = vmatpush2.bf16.msra.mxu0 %v1115_v35  ;;  %v1130_v35 = vld [vmem:[#allocation7 + $0x28] sm:$0xff]  }
  0x4e   :  { %388 = vmatprep.subr.bf16.mxu0 %v1116_v36  ;;  %v1131_v36 = vld [vmem:[#allocation7 + $0x60] sm:$0xff]   ;;  %981 = vmatpush3.bf16.msra.mxu1 %v1130_v35 }
  0x4f   :  { %982 = vmatprep.subr.bf16.mxu1 %v1131_v36 }
  0x51   :  { %389 = vmatpush2.bf16.msra.mxu0 %v1118_v37  ;;  %v1132_v37 = vld [vmem:[#allocation7 + $0x20] sm:$0xff]  }
  0x52   :  { %390 = vmatprep.subr.bf16.mxu0 %v1119_v38  ;;  %v1133_v38 = vld [vmem:[#allocation7 + $0x58] sm:$0xff]   ;;  %983 = vmatpush3.bf16.msra.mxu1 %v1132_v37  ;;  %v1143_v37 = vld [vmem:[#allocation7 + $0xa8] sm:$0xff]  }
  0x53   :  { %984 = vmatprep.subr.bf16.mxu1 %v1133_v38 }
  0x55   :  { %391 = vmatpush2.bf16.msra.mxu0 %v1121_v39 }
  0x56   :  { %392 = vmatprep.subr.bf16.mxu0 %v1122_v40 }
  0x59   :  { %393 = vmatpush2.bf16.msra.mxu0 %v1124_v41 }
  0x9b   :  { %v1051_v42 = vpop.permute.xlu0 %1050 }
  0x9c   :  { %v1061_v43 = vpop.permute.xlu1 %1060  ;;  %v1053_v44 = vunpack.i.h.bf16 %v1051_v42  ;;  %v1052_v45 = vunpack.i.l.bf16 %v1051_v42 }
  0x9d   :  { %v1063_v48 = vunpack.i.h.bf16 %v1061_v43  ;;  %v1062_v49 = vunpack.i.l.bf16 %v1061_v43 }
  0x9e   :  { %v99_v56 = vsel %vm98_vm0, %v63_v46, %v1052_v45  ;;  %v100_v57 = vsel %vm98_vm0, %v64_v47, %v1053_v44 }
  0x9f   :  { %v1056_v50 = vpop.permute.xlu0 %1055 }
  0xa0   :  { %v1058_v51 = vunpack.i.h.bf16 %v1056_v50  ;;  %v1057_v52 = vunpack.i.l.bf16 %v1056_v50  ;;  %v1066_v55 = vpop.permute.xlu1 %1065 }
  0xa1   :  { %v1068_v58 = vunpack.i.h.bf16 %v1066_v55  ;;  %v1067_v59 = vunpack.i.l.bf16 %v1066_v55  ;;  %v1136_v55 = vld [vmem:[#allocation7 + $0x10] sm:$0xff]  }
  0xa2   :  { %v102_v60 = vsel %vm101_vm1, %v99_v56, %v1057_v52  ;;  %v103_v61 = vsel %vm101_vm1, %v100_v57, %v1058_v51  ;;  %v1137_v56 = vld [vmem:[#allocation7 + $0x48] sm:$0xff]  }
  0xa3   :  { %v169_v62 = vsel %vm98_vm0, %v134_v54, %v1068_v58  ;;  %v168_v63 = vsel %vm98_vm0, %v133_v53, %v1067_v59  ;;  %v1071_v0 = vpop.permute.xlu0 %1070  ;;  %v105_v1 = vsel %vm104_vm2, %v102_v60, %v1062_v49  ;;  %v106_v2 = vsel %vm104_vm2, %v103_v61, %v1063_v48  ;;  %v1134_v53 = vld [vmem:[#allocation7 + $0x18] sm:$0xff]   ;;  %v1135_v54 = vld [vmem:[#allocation7 + $0x50] sm:$0xff]   ;;  %v1138_v57 = vld [vmem:[#allocation7 + $0x8] sm:$0xff]  }
  0xa4   :  { %v1073_v3 = vunpack.i.h.bf16 %v1071_v0  ;;  %v1072_v4 = vunpack.i.l.bf16 %v1071_v0  ;;  %v1076_v5 = vpop.permute.xlu1 %1075  ;;  %v111_v6 = vrot.slane %v106_v2, 7  ;;  %v1079_v7 = vpack.i.bf16 %v106_v2, %v105_v1  ;;  %985 = vmatpush3.bf16.msra.mxu1 %v1134_v53  ;;  %v1139_v58 = vld [vmem:[#allocation7 + $0x40] sm:$0xff]   ;;  %v1141_v60 = vld [vmem:[#allocation7 + $0xb8] sm:$0xff]  }
  0xa5   :  { %v1078_v8 = vunpack.i.h.bf16 %v1076_v5  ;;  %v1077_v9 = vunpack.i.l.bf16 %v1076_v5  ;;  %v110_v10 = vrot.slane %v105_v1, 7  ;;  %v117_v11 = vrot.slane %v105_v1, 1  ;;  %986 = vmatprep.subr.bf16.mxu1 %v1135_v54  ;;  %v1140_v59 = vld [vmem:[#allocation7] sm:$0xff]  }
  0xa6   :  { %1080 = vrot.lane.b32.xlu0 %v1079_v7, %s1240_s1  ;;  %v118_v12 = vrot.slane %v106_v2, 1  ;;  %v170_v13 = vsel %vm101_vm1, %v168_v63, %v1072_v4  ;;  %v171_v14 = vsel %vm101_vm1, %v169_v62, %v1073_v3  ;;  %v226_v61 = vlaneseq  ;;  %v224_v0 = vld [vmem:[%s1417_s2] sm:$0x3] }
  0xa7   :  { %v172_v18 = vsel %vm104_vm2, %v170_v13, %v1077_v9  ;;  %v173_v19 = vsel %vm104_vm2, %v171_v14, %v1078_v8  ;;  %v112_v20 = vsel %vm109_vm4, %v110_v10, %v111_v6  ;;  %v115_v42 = vsel %vm109_vm4, 0.0, %v110_v10 }
  0xa8   :  { %v119_v21 = vsel %vm116_vm3, %v117_v11, %v118_v12  ;;  %v122_v22 = vsel %vm116_vm3, %v118_v12, 0.0  ;;  %v177_v23 = vrot.slane %v173_v19, 7  ;;  %v183_v24 = vrot.slane %v173_v19, 1  ;;  %987 = vmatpush3.bf16.msra.mxu1 %v1136_v55 }
  0xa9   :  { %v197_v25 = vpack.c.bf16 %v122_v22, %v119_v21  ;;  %v1084_v26 = vpack.i.bf16 %v173_v19, %v172_v18  ;;  %v176_v27 = vrot.slane %v172_v18, 7  ;;  %v182_v28 = vrot.slane %v172_v18, 1  ;;  %988 = vmatprep.subr.bf16.mxu1 %v1137_v56 }
  0xaa   :  { %v187_v30 = vsel %vm116_vm3, %v183_v24, 0.0  ;;  %v227_v62 = vshrl.u32 %v226_v61, 7 }
  0xab   :  { %935 = vmatprep.mubr.msk.bf16.mxu0 %vm129_vm5, %v197_v25  ;;  %1085 = vrot.lane.b32.xlu1 %v1084_v26, %s1240_s1  ;;  %v184_v32 = vsel %vm116_vm3, %v182_v28, %v183_v24  ;;  %v178_v33 = vsel %vm109_vm4, %v176_v27, %v177_v23  ;;  %v181_v49 = vsel %vm109_vm4, 0.0, %v176_v27 }
  0xac   :  { %v199_v34 = vpack.c.bf16 %v187_v30, %v184_v32  ;;  %989 = vmatpush3.bf16.msra.mxu1 %v1138_v57  ;;  %v228_v63 = vsub.s32 0, %v227_v62  ;;  %v232_v1 = vsub.s32 1, %v227_v62  ;;  %v1142_v30 = vld [vmem:[#allocation7 + $0xb0] sm:$0xff]  }
  0xad   :  { %990 = vmatprep.subr.bf16.mxu1 %v1139_v58 }
  0xae   :  { %v229_v2 = vrot.slane %v224_v0, %v228_v63  ;;  %v233_v3 = vrot.slane %v224_v0, %v232_v1  ;;  %v937_v1 = vld [vmem:[%s1419_s4] ss:$0 sm:$0xff]  ;;  %s1247_s4 = smov 96  }
  0xb0   :  { %991 = vmatpush3.bf16.msra.mxu1 %v1140_v59 }
  0xb1   :  { %1014 = vmatprep.subr.bf16.mxu1 %v1141_v60 }
 0x118   :  { %v1081_v39 = vpop.permute.xlu0 %1080 }
 0x119   :  { %v1083_v40 = vunpack.i.h.bf16 %v1081_v39  ;;  %v1082_v41 = vunpack.i.l.bf16 %v1081_v39 }
 0x11b   :  { %v130_v43 = vsel %vm129_vm5, %v115_v42, %v1082_v41  ;;  %v131_v44 = vsel %vm129_vm5, %v112_v20, %v1083_v40 }
 0x11c   :  { %v196_v45 = vpack.c.bf16 %v131_v44, %v130_v43 }
 0x11d   :  { %v1086_v46 = vpop.permute.xlu1 %1085 }
 0x11e   :  { %v1088_v47 = vunpack.i.h.bf16 %v1086_v46  ;;  %v1087_v48 = vunpack.i.l.bf16 %v1086_v46  ;;  %395 = vmatmul.mubr.bf16.vlgmr.msra.gmra.mxu0 %v196_v45  ;;  %v1144_v45 = vld [vmem:[#allocation7 + $0xa0] sm:$0xff]  }
 0x11f   :  { %936 = vmatprep.mubr.msk.bf16.mxu0 %vm129_vm5, %v199_v34 }
 0x120   :  { %v194_v50 = vsel %vm129_vm5, %v181_v49, %v1087_v48  ;;  %v195_v51 = vsel %vm129_vm5, %v178_v33, %v1088_v47  ;;  %v1145_v47 = vld [vmem:[#allocation7 + $0x98] sm:$0xff]   ;;  %v1146_v48 = vld [vmem:[#allocation7 + $0x90] sm:$0xff]   ;;  %v1147_v49 = vld [vmem:[#allocation7 + $0x88] sm:$0xff]  }
 0x121   :  { %v198_v52 = vpack.c.bf16 %v195_v51, %v194_v50  ;;  %v1148_v50 = vld [vmem:[#allocation7 + $0x80] sm:$0xff]  }
 0x126   :  { %405 = vmatmul.mubr.bf16.gmra.mxu0 %v198_v52 }
 0x1de   :  { %v396_v4 = vpop.f32.mrf.mxu0 }
 0x1df   :  { %v397_v5 = vadd.f32 %v396_v4, %v229_v2 }
 0x1e0   :  { %v398_v6 = vpop.f32.mrf.mxu0 }
 0x1e1   :  { %v415_v7 = vmax.f32 %v397_v5, 0.0  ;;  %v399_v8 = vadd.f32 %v398_v6, %v233_v3 }
 0x1e2   :  { %v400_v9 = vpop.f32.mrf.mxu0 }
 0x1e3   :  { %v401_v10 = vadd.f32 %v400_v9, %v229_v2  ;;  %v419_v12 = vadd.f32 %v415_v7, %v399_v8 }
 0x1e4   :  { %v402_v11 = vpop.f32.mrf.mxu0 }
 0x1e5   :  { %v416_v13 = vmax.f32 %v401_v10, 0.0  ;;  %v403_v14 = vadd.f32 %v402_v11, %v233_v3  ;;  %v425_v19 = vrot.slane %v419_v12, 7  ;;  %v431_v36 = vrot.slane %v419_v12, 1 }
 0x1e6   :  { %v406_v15 = vpop.f32.mrf.mxu0 }
 0x1e7   :  { %v420_v16 = vadd.f32 %v416_v13, %v403_v14  ;;  %v407_v17 = vadd.f32 %v406_v15, %v229_v2 }
 0x1e8   :  { %v408_v18 = vpop.f32.mrf.mxu0 }
 0x1e9   :  { %v426_v20 = vrot.slane %v420_v16, 7  ;;  %v417_v21 = vmax.f32 %v407_v17, 0.0  ;;  %v409_v22 = vadd.f32 %v408_v18, %v233_v3  ;;  %v452_v24 = vpack.c.bf16 %v420_v16, %v419_v12 }
 0x1ea   :  { %v410_v23 = vpop.f32.mrf.mxu0  ;;  %v432_v34 = vrot.slane %v420_v16, 1 }
 0x1eb   :  { %v411_v25 = vadd.f32 %v410_v23, %v229_v2  ;;  %v427_v26 = vsel %vm109_vm4, %v425_v19, %v426_v20  ;;  %688 = vmatprep.mubr.bf16.mxu1 %v452_v24  ;;  %v421_v31 = vadd.f32 %v417_v21, %v409_v22 }
 0x1ec   :  { %v412_v28 = vpop.f32.mrf.mxu0  ;;  %v964_v29 = vpack.c.bf16 %v427_v26, %v425_v19  ;;  %v433_v41 = vsel %vm116_vm3, %v431_v36, %v432_v34 }
 0x1ed   :  { %v418_v32 = vmax.f32 %v411_v25, 0.0  ;;  %v413_v33 = vadd.f32 %v412_v28, %v233_v3  ;;  %v439_v38 = vrot.slane %v421_v31, 7  ;;  %v971_v46 = vpack.c.bf16 %v432_v34, %v433_v41 }
 0x1ee   :  { %965 = vmatmul.mubr.msk.bf16.vlgmr.msra.gmra.mxu1 %vm1337_vm8, %v964_v29  ;;  %v445_v52 = vrot.slane %v421_v31, 1 }
 0x1ef   :  { %v422_v35 = vadd.f32 %v418_v32, %v413_v33  ;;  %1015 = vmatpush3.bf16.msra.mxu1 %v1141_v60 }
 0x1f0   :  { %1016 = vmatprep.subr.bf16.mxu1 %v1142_v30 }
 0x1f1   :  { %v440_v39 = vrot.slane %v422_v35, 7  ;;  %v455_v40 = vpack.c.bf16 %v422_v35, %v421_v31  ;;  %v446_v51 = vrot.slane %v422_v35, 1 }
 0x1f3   :  { %1017 = vmatpush3.bf16.msra.mxu1 %v1142_v30  ;;  %696 = vmatprep.mubr.bf16.mxu1 %v455_v40  ;;  %v441_v42 = vsel %vm109_vm4, %v439_v38, %v440_v39  ;;  %v447_v53 = vsel %vm116_vm3, %v445_v52, %v446_v51 }
 0x1f4   :  { %1018 = vmatprep.subr.bf16.mxu1 %v1143_v37  ;;  %v968_v43 = vpack.c.bf16 %v441_v42, %v439_v38  ;;  %v974_v54 = vpack.c.bf16 %v446_v51, %v447_v53 }
 0x1f6   :  { %969 = vmatmul.mubr.msk.bf16.gmra.mxu1 %vm1337_vm8, %v968_v43 }
 0x1f7   :  { %1019 = vmatpush3.bf16.msra.mxu1 %v1143_v37  ;;  %1030 = vmatprep.mubr.msk.bf16.mxu1 %vm1347_vm9, %v971_v46 }
 0x1f8   :  { %1020 = vmatprep.subr.bf16.mxu1 %v1144_v45 }
 0x1fb   :  { %1021 = vmatpush3.bf16.msra.mxu1 %v1144_v45 }
 0x1fc   :  { %1022 = vmatprep.subr.bf16.mxu1 %v1145_v47 }
 0x1ff   :  { %1023 = vmatpush3.bf16.msra.mxu1 %v1145_v47 }
 0x200   :  { %1024 = vmatprep.subr.bf16.mxu1 %v1146_v48 }
 0x203   :  { %1025 = vmatpush3.bf16.msra.mxu1 %v1146_v48 }
 0x204   :  { %1026 = vmatprep.subr.bf16.mxu1 %v1147_v49 }
 0x207   :  { %1027 = vmatpush3.bf16.msra.mxu1 %v1147_v49 }
 0x208   :  { %1028 = vmatprep.subr.bf16.mxu1 %v1148_v50 }
 0x20b   :  { %1029 = vmatpush3.bf16.msra.mxu1 %v1148_v50 }
 0x20e   :  { %1031 = vmatmul.mubr.msk.bf16.vlgmr.msra.gmra.mxu1 %vm1347_vm9, %v974_v54 }
 0x2ae   :  { %v992_v55 = vpop.f32.mrf.mxu1 }
 0x2b0   :  { %v993_v56 = vpop.f32.mrf.mxu1 }
 0x2b1   :  { %v994_v0 = vadd.f32 %v993_v56, %v992_v55 }
 0x2b2   :  { %v995_v57 = vpop.f32.mrf.mxu1 }
 0x2b3   :  { %v691_v7 = vadd.f32 %v994_v0, %v937_v1 }
 0x2b4   :  { %v996_v58 = vpop.f32.mrf.mxu1 }
 0x2b5   :  { %v997_v5 = vadd.f32 %v996_v58, %v995_v57 }
 0x2b6   :  { %v998_v59 = vpop.f32.mrf.mxu1 }
 0x2b7   :  { %v694_v15 = vadd.f32 %v997_v5, %v937_v1 }
 0x2b8   :  { %v999_v60 = vpop.f32.mrf.mxu1 }
 0x2b9   :  { %v1000_v62 = vadd.f32 %v999_v60, %v998_v59 }
 0x2ba   :  { %v1001_v61 = vpop.f32.mrf.mxu1 }
 0x2bb   :  { %v699_v3 = vadd.f32 %v1000_v62, %v937_v1 }
 0x2bc   :  { %v1002_v63 = vpop.f32.mrf.mxu1 }
 0x2bd   :  { %v1003_v2 = vadd.f32 %v1002_v63, %v1001_v61 }
 0x2bf   :  { %v702_v11 = vadd.f32 %v1003_v2, %v937_v1 }
 0x2ce   :  { %v1032_v4 = vpop.f32.mrf.mxu1 }
 0x2cf   :  { %v748_v6 = vadd.f32 %v1032_v4, %v699_v3 }
 0x2d0   :  { %v739_v8 = vpop.f32.mrf.mxu1 }
 0x2d1   :  { %v756_v9 = vmax.f32 %v748_v6, 0.0  ;;  %v740_v10 = vadd.f32 %v739_v8, %v691_v7 }
 0x2d2   :  { %v1033_v12 = vpop.f32.mrf.mxu1 }
 0x2d3   :  { %826 = vst.msk [vmem:[#allocation8 + $0x80] sm:$0xff] %vm98_vm0, %v756_v9  ;;  %v754_v13 = vmax.f32 %v740_v10, 0.0  ;;  %v751_v14 = vadd.f32 %v1033_v12, %v702_v11  ;;  %830 = vrot.lane.b32.xlu0 %v756_v9, %s1246_s15 }
 0x2d4   :  { %v742_v16 = vpop.f32.mrf.mxu1 }
 0x2d5   :  { %758 = vst.msk [vmem:[#allocation8] sm:$0xff] %vm98_vm0, %v754_v13  ;;  %v757_v17 = vmax.f32 %v751_v14, 0.0  ;;  %v743_v18 = vadd.f32 %v742_v16, %v694_v15 }
 0x2d7   :  { %827 = vst.msk [vmem:[#allocation8 + $0x88] sm:$0xff] %vm98_vm0, %v757_v17  ;;  %v755_v19 = vmax.f32 %v743_v18, 0.0  ;;  %832 = vrot.lane.b32.xlu1 %v757_v17, %s1246_s15  ;;  %839 = vrot.lane.b32.xlu0 %v756_v9, %s1247_s4 }
 0x2d9   :  { %759 = vst.msk [vmem:[#allocation8 + $0x8] sm:$0xff] %vm98_vm0, %v755_v19 }
 0x2db   :  { %841 = vrot.lane.b32.xlu1 %v757_v17, %s1247_s4  ;;  %848 = vrot.lane.b32.xlu0 %v756_v9, %s1248_s16 }
 0x2df   :  { %850 = vrot.lane.b32.xlu1 %v757_v17, %s1248_s16  ;;  %857 = vrot.lane.b32.xlu0 %v756_v9, %s1240_s1 }
 0x2e3   :  { %859 = vrot.lane.b32.xlu1 %v757_v17, %s1240_s1  ;;  %866 = vrot.lane.b32.xlu0 %v756_v9, %s1243_s11 }
 0x2e7   :  { %868 = vrot.lane.b32.xlu1 %v757_v17, %s1243_s11  ;;  %875 = vrot.lane.b32.xlu0 %v756_v9, %s1244_s3 }
 0x2eb   :  { %877 = vrot.lane.b32.xlu1 %v757_v17, %s1244_s3  ;;  %762 = vrot.lane.b32.xlu0 %v754_v13, %s1246_s15 }
 0x2ef   :  { %764 = vrot.lane.b32.xlu1 %v755_v19, %s1246_s15  ;;  %771 = vrot.lane.b32.xlu0 %v754_v13, %s1247_s4 }
 0x2f3   :  { %773 = vrot.lane.b32.xlu1 %v755_v19, %s1247_s4  ;;  %780 = vrot.lane.b32.xlu0 %v754_v13, %s1248_s16 }
 0x2f7   :  { %782 = vrot.lane.b32.xlu1 %v755_v19, %s1248_s16  ;;  %789 = vrot.lane.b32.xlu0 %v754_v13, %s1240_s1 }
 0x2fb   :  { %791 = vrot.lane.b32.xlu1 %v755_v19, %s1240_s1  ;;  %798 = vrot.lane.b32.xlu0 %v754_v13, %s1243_s11 }
 0x2ff   :  { %800 = vrot.lane.b32.xlu1 %v755_v19, %s1243_s11  ;;  %807 = vrot.lane.b32.xlu0 %v754_v13, %s1244_s3 }
 0x303   :  { %809 = vrot.lane.b32.xlu1 %v755_v19, %s1244_s3  ;;  %816 = vrot.lane.b32.xlu0 %v754_v13, %s1242_s0 }
 0x307   :  { %818 = vrot.lane.b32.xlu1 %v755_v19, %s1242_s0  ;;  %884 = vrot.lane.b32.xlu0 %v756_v9, %s1242_s0 }
 0x30b   :  { %886 = vrot.lane.b32.xlu1 %v757_v17, %s1242_s0 }
 0x345   :  { %v831_v20 = vpop.permute.xlu0 %830 }
 0x346   :  { %837 = vst.msk [vmem:[#allocation8 + $0x90] sm:$0xff] %vm98_vm0, %v831_v20 }
 0x349   :  { %v833_v21 = vpop.permute.xlu1 %832  ;;  %v840_v22 = vpop.permute.xlu0 %839 }
 0x34a   :  { %838 = vst.msk [vmem:[#allocation8 + $0x98] sm:$0xff] %vm98_vm0, %v833_v21  ;;  %846 = vst.msk [vmem:[#allocation8 + $0xa0] sm:$0xff] %vm98_vm0, %v840_v22 }
 0x34d   :  { %v842_v23 = vpop.permute.xlu1 %841  ;;  %v849_v24 = vpop.permute.xlu0 %848 }
 0x34e   :  { %847 = vst.msk [vmem:[#allocation8 + $0xa8] sm:$0xff] %vm98_vm0, %v842_v23  ;;  %855 = vst.msk [vmem:[#allocation8 + $0xb0] sm:$0xff] %vm98_vm0, %v849_v24 }
 0x351   :  { %v851_v25 = vpop.permute.xlu1 %850  ;;  %v858_v26 = vpop.permute.xlu0 %857 }
 0x352   :  { %856 = vst.msk [vmem:[#allocation8 + $0xb8] sm:$0xff] %vm98_vm0, %v851_v25  ;;  %864 = vst.msk [vmem:[#allocation8 + $0xc0] sm:$0xff] %vm98_vm0, %v858_v26 }
 0x355   :  { %v860_v27 = vpop.permute.xlu1 %859  ;;  %v867_v28 = vpop.permute.xlu0 %866 }
 0x356   :  { %865 = vst.msk [vmem:[#allocation8 + $0xc8] sm:$0xff] %vm98_vm0, %v860_v27  ;;  %873 = vst.msk [vmem:[#allocation8 + $0xd0] sm:$0xff] %vm98_vm0, %v867_v28 }
 0x359   :  { %v869_v29 = vpop.permute.xlu1 %868  ;;  %v876_v30 = vpop.permute.xlu0 %875 }
 0x35a   :  { %874 = vst.msk [vmem:[#allocation8 + $0xd8] sm:$0xff] %vm98_vm0, %v869_v29  ;;  %882 = vst.msk [vmem:[#allocation8 + $0xe0] sm:$0xff] %vm98_vm0, %v876_v30 }
 0x35d   :  { %v878_v31 = vpop.permute.xlu1 %877  ;;  %v763_v32 = vpop.permute.xlu0 %762 }
 0x35e   :  { %883 = vst.msk [vmem:[#allocation8 + $0xe8] sm:$0xff] %vm98_vm0, %v878_v31  ;;  %769 = vst.msk [vmem:[#allocation8 + $0x10] sm:$0xff] %vm98_vm0, %v763_v32 }
 0x361   :  { %v765_v33 = vpop.permute.xlu1 %764  ;;  %v772_v34 = vpop.permute.xlu0 %771 }
 0x362   :  { %770 = vst.msk [vmem:[#allocation8 + $0x18] sm:$0xff] %vm98_vm0, %v765_v33  ;;  %778 = vst.msk [vmem:[#allocation8 + $0x20] sm:$0xff] %vm98_vm0, %v772_v34 }
 0x365   :  { %v774_v35 = vpop.permute.xlu1 %773  ;;  %v781_v36 = vpop.permute.xlu0 %780 }
 0x366   :  { %779 = vst.msk [vmem:[#allocation8 + $0x28] sm:$0xff] %vm98_vm0, %v774_v35  ;;  %787 = vst.msk [vmem:[#allocation8 + $0x30] sm:$0xff] %vm98_vm0, %v781_v36 }
 0x369   :  { %v783_v37 = vpop.permute.xlu1 %782  ;;  %v790_v38 = vpop.permute.xlu0 %789 }
 0x36a   :  { %788 = vst.msk [vmem:[#allocation8 + $0x38] sm:$0xff] %vm98_vm0, %v783_v37  ;;  %796 = vst.msk [vmem:[#allocation8 + $0x40] sm:$0xff] %vm98_vm0, %v790_v38 }
 0x36d   :  { %v792_v39 = vpop.permute.xlu1 %791  ;;  %v799_v40 = vpop.permute.xlu0 %798 }
 0x36e   :  { %797 = vst.msk [vmem:[#allocation8 + $0x48] sm:$0xff] %vm98_vm0, %v792_v39  ;;  %805 = vst.msk [vmem:[#allocation8 + $0x50] sm:$0xff] %vm98_vm0, %v799_v40 }
 0x371   :  { %v801_v41 = vpop.permute.xlu1 %800  ;;  %v808_v42 = vpop.permute.xlu0 %807 }
 0x372   :  { %806 = vst.msk [vmem:[#allocation8 + $0x58] sm:$0xff] %vm98_vm0, %v801_v41  ;;  %814 = vst.msk [vmem:[#allocation8 + $0x60] sm:$0xff] %vm98_vm0, %v808_v42 }
 0x375   :  { %v810_v43 = vpop.permute.xlu1 %809  ;;  %v817_v44 = vpop.permute.xlu0 %816 }
 0x376   :  { %815 = vst.msk [vmem:[#allocation8 + $0x68] sm:$0xff] %vm98_vm0, %v810_v43  ;;  %823 = vst.msk [vmem:[#allocation8 + $0x70] sm:$0xff] %vm98_vm0, %v817_v44 }
 0x379   :  { %v819_v45 = vpop.permute.xlu1 %818  ;;  %v885_v46 = vpop.permute.xlu0 %884 }
 0x37a   :  { %824 = vst.msk [vmem:[#allocation8 + $0x78] sm:$0xff] %vm98_vm0, %v819_v45  ;;  %891 = vst.msk [vmem:[#allocation8 + $0xf0] sm:$0xff] %vm98_vm0, %v885_v46 }
 0x37d   :  { %v887_v47 = vpop.permute.xlu1 %886 }
 0x37e   :  { %892 = vst.msk [vmem:[#allocation8 + $0xf8] sm:$0xff] %vm98_vm0, %v887_v47 }
 0x37f   :  { %1220 = shalt.err (!%p1217_p5)
}
 0x380   :  { %904 = dma.vmem_to_hbm [thread:$0]  %s899_s18, 4096, %s1420_s5, [#allocation4], %s1237_s23, %s1237_s23, %s1238_s24  }
 0x381   :  { %1233 = dma.done.wait [#allocation4], 4096  }
 0x382   :  { %1234 = vsyncadd [#allocation4], 4294963200 }
 0x383   :  { %908 = vsyncpa [#allocation3], 1 }
 0x384   :  { %909 = vsyncpa [#allocation6], 1 }
 0x385   :  { %910 = vsyncpa [#allocation4], 1 }

</bundles_post_ra>
